<compile_context>
chip_gen: v7x
topology: tpu7x:2x2x1
jax: 0.10.0
libtpu: 0.0.40
codegen_flags: <defaults>
</compile_context>

<pallas_src>
import functools

import jax
import jax.numpy as jnp
from jax.experimental import pallas as pl
from jax.experimental.pallas import tpu as pltpu

_LANE = 512                       # lane-dense output width (multiple of 128)
_TARGET_TILE_BYTES = 4 << 20      # ~4 MiB tiles -> <= 16 MiB double-buffered
_SMALL_BYPASS_BYTES = 256 << 10   # below this, skip pallas_call entirely


# ---------------------------------------------------------------------------
# Kernel bodies
# ---------------------------------------------------------------------------
def _dma_identity_kernel(x_hbm_ref, o_hbm_ref, sem):
    """Whole-array HBM->HBM copy on the DMA engine (no VMEM/vreg round trip)."""
    cp = pltpu.make_async_copy(x_hbm_ref, o_hbm_ref, sem)
    cp.start()
    cp.wait()


def _vmem_identity_kernel(x_ref, o_ref):
    """Tiled VMEM pass-through (full-width, unmasked lane-dense stores)."""
    o_ref[...] = x_ref[...]


# ---------------------------------------------------------------------------
# Copy paths
# ---------------------------------------------------------------------------
def _dma_copy(state):
    """Shape-agnostic identity copy: one HBM->HBM DMA, no tiling constraints."""
    return pl.pallas_call(
        _dma_identity_kernel,
        out_shape=jax.ShapeDtypeStruct(state.shape, state.dtype),
        in_specs=[pl.BlockSpec(memory_space=pl.ANY)],
        out_specs=pl.BlockSpec(memory_space=pl.ANY),
        scratch_shapes=[pltpu.SemaphoreType.DMA(())],
    )(state)


def _vmem_tiled_copy(state):
    """Lane-dense tiled VMEM copy.  Caller guarantees state.size % _LANE == 0."""
    total = int(state.size)
    itemsize = jnp.dtype(state.dtype).itemsize
    sublane = {4: 8, 2: 16, 1: 32}.get(itemsize, 8)
    rows = total // _LANE

    if rows <= sublane:
        # Block equals the full row extent -> always a legal block shape.
        tile_rows = rows
    else:
        target = max(
            sublane,
            (_TARGET_TILE_BYTES // (_LANE * itemsize)) // sublane * sublane,
        )
        # Cap at ~half the rows so the grid has >= 2 steps and the "parallel"
        # axis can shard across v7x's two TensorCores.
        half = pl.cdiv(pl.cdiv(rows, 2), sublane) * sublane
        tile_rows = max(sublane, min(target, half))

    grid = (pl.cdiv(rows, tile_rows),)  # last partial block is masked by Pallas
    x2d = state.reshape(rows, _LANE)

    out2d = pl.pallas_call(
        _vmem_identity_kernel,
        out_shape=jax.ShapeDtypeStruct((rows, _LANE), state.dtype),
        grid=grid,
        in_specs=[pl.BlockSpec((tile_rows, _LANE), lambda i: (i, 0))],
        out_specs=pl.BlockSpec((tile_rows, _LANE), lambda i: (i, 0)),
        compiler_params=pltpu.CompilerParams(
            dimension_semantics=("parallel",),
            vmem_limit_bytes=32 * 1024 * 1024,
        ),
    )(x2d)
    return out2d.reshape(state.shape)


@functools.partial(jax.jit, static_argnames=("method", "force_kernel"))
def pallas_identity_copy(state, *, method="dma", force_kernel=False):
    """Optional materialized on-device copy of `state`.

    The module forward itself is a no-op; use this only when an explicit
    device copy is actually wanted.
    """
    total = int(state.size)
    nbytes = total * jnp.dtype(state.dtype).itemsize

    if total == 0:
        return state
    if not force_kernel and nbytes <= _SMALL_BYPASS_BYTES:
        return state  # kernel dispatch would dominate a tiny copy

    if method == "vmem" and total % _LANE == 0:
        return _vmem_tiled_copy(state)
    # DMA path handles any shape/dtype with no reshape and no padding.
    return _dma_copy(state)


# ---------------------------------------------------------------------------
# Forward-pass semantics of the module
# ---------------------------------------------------------------------------
def base_agent_forward(state, *args):
    """Base_Agent.forward performs no computation -> zero-cost pass-through."""
    return state


class BaseAgentJAX:
    """JAX/Pallas mirror of Base_Agent: no parameters, no-op forward."""

    def __init__(self):
        # Base_Agent.__init__ defines no parameters or submodules.
        pass

    def build_model(self):
        pass

    def forward(self, state, *args):
        # TODO(synk): forward has no defined computation in the source module;
        # it returns None exactly like the PyTorch `pass` body.
        return None

    def loss(self, *args):
        pass


if __name__ == "__main__":
    key = jax.random.PRNGKey(0)

    # Small RL-style image observation (batch=2, channels=4, 16x16).
    state = jax.random.normal(key, (2, 4, 16, 16), dtype=jnp.float32)

    # 1) Semantic forward: no-op, no kernel, no HBM traffic.
    assert base_agent_forward(state) is state
    assert BaseAgentJAX().forward(state) is None

    # 2) Explicit device copy via HBM->HBM DMA (force past the small bypass).
    out_dma = pallas_identity_copy(state, force_kernel=True)
    jax.block_until_ready(out_dma)
    assert out_dma.shape == state.shape and out_dma.dtype == state.dtype
    assert bool(jnp.all(out_dma == state))

    # 3) Explicit device copy via the lane-dense tiled VMEM path (grid=(1,)).
    out_vmem = pallas_identity_copy(state, method="vmem", force_kernel=True)
    jax.block_until_ready(out_vmem)
    assert bool(jnp.all(out_vmem == state))

    # 4) Medium input: exercises a multi-step (>=2) parallel grid on the
    #    VMEM path without any padding (2 MiB, 1024 x 512 rows).
    key, sub = jax.random.split(key)
    med = jax.random.normal(sub, (2, 8, 128, 256), dtype=jnp.float32)
    out_med = pallas_identity_copy(med, method="vmem", force_kernel=True)
    jax.block_until_ready(out_med)
    assert bool(jnp.all(out_med == med))

    # 5) Odd shape (size not a multiple of the 512-lane layout): routed to the
    #    shape-agnostic DMA path -> still no jnp.pad / slice anywhere.
    key, sub = jax.random.split(key)
    odd = jax.random.normal(sub, (3, 5, 17, 31), dtype=jnp.float32)
    out_odd = pallas_identity_copy(odd, method="vmem", force_kernel=True)
    jax.block_until_ready(out_odd)
    assert out_odd.shape == odd.shape
    assert bool(jnp.all(out_odd == odd))

    # 6) Small-input bypass: no pallas_call is launched at all.
    bypassed = pallas_identity_copy(state)
    jax.block_until_ready(bypassed)
    assert bool(jnp.all(bypassed == state))

    print("KERNEL_OK")
</pallas_src>

<mosaic_0001>
module attributes {stable_mosaic.version = 11 : i64} {
  func.func @_dma_identity_kernel(%arg0: memref<2x4x16x16xf32, #tpu.memory_space<any>>, %arg1: memref<2x4x16x16xf32, #tpu.memory_space<any>>, %arg2: memref<!tpu.dma_semaphore, #tpu.memory_space<semaphore_mem>>) attributes {dimension_semantics = [], scalar_prefetch = 0 : i64, scratch_operands = 1 : i64, tpu.core_type = #tpu.core_type<tc>} {
    tpu.enqueue_dma source(%arg0 : memref<2x4x16x16xf32, #tpu.memory_space<any>>) target(%arg1 : memref<2x4x16x16xf32, #tpu.memory_space<any>>) target_semaphore(%arg2 : memref<!tpu.dma_semaphore, #tpu.memory_space<semaphore_mem>>)
    tpu.wait_dma2 semaphore(%arg2 : memref<!tpu.dma_semaphore, #tpu.memory_space<semaphore_mem>>) src(%arg0 : memref<2x4x16x16xf32, #tpu.memory_space<any>>) dst(%arg1 : memref<2x4x16x16xf32, #tpu.memory_space<any>>)
    return
  }
}

</mosaic_0001>

<bundles_post_ra>
// kernel: pallas_identity_copy.1
= control target key start
LH: loop header
LB: loop body
LE: loop exit
PB: predicated region body
PF: predicated region fallthrough
CT: control target
= control target key end

     0   :  { %s36_s6 = smov [#allocation2]   ;;  %s37_s7 = smov [#allocation3]   ;;  %s55_s0 = inlined_call_operand.hbm [shape: f32[2,4,16,16], index: 0, kind: input, shape index: {}]   ;;  %s56_s1 = inlined_call_operand.hbm [shape: f32[2,4,16,16], index: 1, kind: output, shape index: {}]  }
   0x1   :  { %s38_s8 = smov 0  }
   0x2   :  { %18 = dma.general %s55_s0, 2048, %s56_s1, %s36_s6, %s37_s7, [#allocation4], %s38_s8, 0  }
   0x3   :  { %34 = dma.done.wait [#allocation2], 2048 }
   0x4   :  { %35 = vsyncadd [#allocation2], 4294965248 }
   0x5   :  { %24 = vsyncmov [#allocation2] }
   0x8   :  { %s25_s13 = vpop.sfrf %24 }
   0x9   :  { %p30_p0 = scmp.ne.s32.totalorder %s25_s13, 0 }
   0xb   :  { %29 = shalt.err (%p30_p0)  }

</bundles_post_ra>
